<compile_context>
chip_gen: v6e
topology: v6e:2x2x1
jax: 0.10.0
libtpu: 0.0.40
codegen_flags: <defaults>
</compile_context>

<pallas_src>
import functools

import jax
import jax.numpy as jnp
from jax.experimental import pallas as pl
from jax.experimental.pallas import tpu as pltpu


def find_multiple(n: int, k: int) -> int:
    return n if n % k == 0 else n + k - n % k


def _round_up(n: int, k: int) -> int:
    return (n + k - 1) // k * k


def _vmem_capacity_bytes() -> int:
    try:
        return int(pltpu.get_tpu_info().vmem_capacity_bytes)
    except Exception:
        return 64 * 1024 * 1024  # conservative (v7x-sized) fallback


def _select_tiles(T, D, I, tile_t, tile_i):
    vmem_cap = _vmem_capacity_bytes()
    if tile_t is None:
        # 16-sublane aligned (bf16 packing), big enough to feed the 256x256 MXU.
        tile_t = min(_round_up(T, 16), 256)
    T_pad = _round_up(T, tile_t)
    if tile_i is None:
        # 3 weight matrices x 2 pipeline buffers x bf16 tiles kept within ~40% of VMEM,
        # leaving room for x/out tiles, the f32 accumulator and (tT, tI) f32 temps.
        budget = int(0.4 * vmem_cap)
        max_ti = max(budget // (3 * 2 * 2 * D), 128)
        tile_i = I
        for cand in (2048, 1536, 1024, 768, 512, 384, 256, 128):
            if cand <= max_ti and I % cand == 0:
                tile_i = cand
                break
    vmem_limit = min(int(0.85 * vmem_cap), 128 * 1024 * 1024)
    return tile_t, T_pad, tile_i, vmem_limit


# ----------------------------- gating kernel ---------------------------------
def gating_kernel(x_ref, gwt_ref, p_ref, *, num_experts):
    # x_ref: (tT, D) bf16 ; gwt_ref: (D, E_pad) bf16 ; p_ref: (tT, E_pad) f32
    s = jnp.dot(x_ref[...], gwt_ref[...], preferred_element_type=jnp.float32)
    lane = jax.lax.broadcasted_iota(jnp.int32, s.shape, 1)
    s = jnp.where(lane < num_experts, s, jnp.float32(-1e30))  # mask padded experts
    m = jnp.max(s, axis=-1, keepdims=True)
    p = jnp.exp(s - m)
    p_ref[...] = p * pl.reciprocal(jnp.sum(p, axis=-1, keepdims=True), approx=True)


def moe_gating(x2d, gate_w, *, tile_t=None):
    """softmax(x @ gate_w.T) with a T-tiled, lane-dense (E padded to 128) kernel."""
    T, D = x2d.shape
    E = gate_w.shape[0]
    E_pad = _round_up(max(E, 128), 128)
    if tile_t is None:
        tile_t = min(_round_up(T, 16), 256)
    T_pad = _round_up(T, tile_t)
    n_t = T_pad // tile_t

    x_pad = jnp.pad(x2d, ((0, T_pad - T), (0, 0)))
    gw_pad = jnp.zeros((E_pad, D), gate_w.dtype).at[:E, :].set(gate_w)
    gwt = jnp.transpose(gw_pad, (1, 0))  # (D, E_pad): contraction-friendly layout

    probs = pl.pallas_call(
        functools.partial(gating_kernel, num_experts=E),
        out_shape=jax.ShapeDtypeStruct((T_pad, E_pad), jnp.float32),
        grid_spec=pl.GridSpec(
            grid=(n_t,),
            in_specs=[
                pl.BlockSpec((tile_t, D), lambda t: (t, 0)),
                pl.BlockSpec((D, E_pad), lambda t: (0, 0)),
            ],
            out_specs=pl.BlockSpec((tile_t, E_pad), lambda t: (t, 0)),
        ),
        compiler_params=pltpu.CompilerParams(dimension_semantics=("parallel",)),
        cost_estimate=pl.CostEstimate(
            flops=2 * T_pad * D * E_pad,
            transcendentals=T_pad * E_pad,
            bytes_accessed=T_pad * D * 2 + D * E_pad * 2 + T_pad * E_pad * 4,
        ),
    )(x_pad, gwt)
    return probs[:T, :E]


# --------------------------- expert FFN kernel --------------------------------
def moe_ffn_kernel(active_ids_ref, num_active_ref,         # scalar-prefetch (SMEM)
                   x_ref, w1_ref, w3_ref, w2_ref, cw_ref,  # inputs
                   o_ref,                                  # output
                   acc_ref):                               # scratch
    e = pl.program_id(1)
    i = pl.program_id(2)
    n_e = pl.num_programs(1)
    n_i = pl.num_programs(2)

    @pl.when(jnp.logical_and(e == 0, i == 0))
    def _():
        acc_ref[...] = jnp.zeros_like(acc_ref)

    # Skip grid slots past the number of active experts (their weight blocks re-map
    # to already-resident tiles, so the DMA is skipped too).
    @pl.when(e < num_active_ref[0])
    def _():
        x = x_ref[...]                                                  # (tT, D)  bf16
        h1 = jnp.dot(x, w1_ref[0], preferred_element_type=jnp.float32)  # (tT, tI)
        h3 = jnp.dot(x, w3_ref[0], preferred_element_type=jnp.float32)  # (tT, tI)
        h = (h1 * jax.nn.sigmoid(h1)) * h3                              # silu(h1)*h3, f32
        y = jnp.dot(h.astype(jnp.bfloat16), w2_ref[0],
                    preferred_element_type=jnp.float32)                 # (tT, D)
        acc_ref[...] += cw_ref[0] * y                                   # (tT,1)*(tT,D)

    @pl.when(jnp.logical_and(e == n_e - 1, i == n_i - 1))
    def _():
        o_ref[...] = acc_ref[...].astype(o_ref.dtype)


def _moe_expert_ffn(x_pad, w1t, w3t, w2t, cw_etl, active_ids, num_active_arr,
                    *, tile_t, tile_i, vmem_limit):
    T_pad, D = x_pad.shape
    E, _, I = w1t.shape
    n_t = T_pad // tile_t
    n_i = I // tile_i

    return pl.pallas_call(
        moe_ffn_kernel,
        out_shape=jax.ShapeDtypeStruct((T_pad, D), jnp.bfloat16),
        grid_spec=pltpu.PrefetchScalarGridSpec(
            num_scalar_prefetch=2,
            grid=(n_t, E, n_i),
            in_specs=[
                pl.BlockSpec((tile_t, D), lambda t, e, i, ids, na: (t, 0)),
                pl.BlockSpec((1, D, tile_i), lambda t, e, i, ids, na: (ids[e], 0, i)),
                pl.BlockSpec((1, D, tile_i), lambda t, e, i, ids, na: (ids[e], 0, i)),
                pl.BlockSpec((1, tile_i, D), lambda t, e, i, ids, na: (ids[e], i, 0)),
                pl.BlockSpec((1, tile_t, 1), lambda t, e, i, ids, na: (ids[e], t, 0)),
            ],
            out_specs=pl.BlockSpec((tile_t, D), lambda t, e, i, ids, na: (t, 0)),
            scratch_shapes=[pltpu.VMEM((tile_t, D), jnp.float32)],
        ),
        compiler_params=pltpu.CompilerParams(
            # T tiles split across TensorCores (megacore); E/I carry the accumulator.
            dimension_semantics=("parallel", "arbitrary", "arbitrary"),
            vmem_limit_bytes=vmem_limit,
        ),
        cost_estimate=pl.CostEstimate(
            flops=2 * 3 * T_pad * D * I * E,
            transcendentals=T_pad * I * E,
            bytes_accessed=E * 3 * I * D * 2 + 2 * T_pad * D * 2 + E * T_pad * 4,
        ),
    )(active_ids, num_active_arr, x_pad, w1t, w3t, w2t, cw_etl)


def moe_after_gating(x2d, w1, w2, w3, expert_weights, expert_indices,
                     *, tile_t=None, tile_i=None):
    """Equivalent of MOEFeedForwardAfterGating._forward_single."""
    T, D = x2d.shape
    E, I, _ = w1.shape

    ew = expert_weights.astype(jnp.float32)
    ew = ew / jnp.sum(ew, axis=-1, keepdims=True)                   # module's renorm
    onehot = jax.nn.one_hot(expert_indices, E, dtype=jnp.float32)   # (T, A, E)
    cw_te = jnp.einsum('ta,tae->te', ew, onehot)                    # dense combine weights

    tile_t, T_pad, tile_i, vmem_limit = _select_tiles(T, D, I, tile_t, tile_i)
    assert T_pad % tile_t == 0 and I % tile_i == 0 and tile_t % 8 == 0

    x_pad = jnp.pad(x2d, ((0, T_pad - T), (0, 0)))
    cw_etl = jnp.transpose(jnp.pad(cw_te, ((0, T_pad - T), (0, 0))), (1, 0))[:, :, None]

    # Active-expert tables (scalar-prefetched to SMEM). Slots >= num_active repeat the
    # last active expert (already-resident blocks -> no extra DMA) and are pl.when'd off.
    expert_hit = jnp.any(cw_te > 0.0, axis=0)
    num_active = jnp.sum(expert_hit.astype(jnp.int32))
    order = jnp.argsort(jnp.where(expert_hit, 0, 1).astype(jnp.int32)).astype(jnp.int32)
    last_active = order[jnp.maximum(num_active - 1, 0)]
    active_ids = jnp.where(jnp.arange(E, dtype=jnp.int32) < num_active, order, last_active)
    num_active_arr = jnp.reshape(num_active, (1,)).astype(jnp.int32)

    # One-time layout plumbing: contraction dim leads the RHS in every in-kernel matmul.
    # (In a real model these would be stored pre-transposed in HBM.)
    w1t = jnp.transpose(w1, (0, 2, 1))   # (E, D, I)
    w3t = jnp.transpose(w3, (0, 2, 1))   # (E, D, I)
    w2t = jnp.transpose(w2, (0, 2, 1))   # (E, I, D)

    out = _moe_expert_ffn(x_pad, w1t, w3t, w2t, cw_etl, active_ids, num_active_arr,
                          tile_t=tile_t, tile_i=tile_i, vmem_limit=vmem_limit)
    return out[:T]


# ------------------------------ full forward ----------------------------------
def moe_feed_forward(x, gate_w, w1, w2, w3, num_activated_experts,
                     *, tile_t=None, tile_i=None):
    """x: (..., D) -> (T, D) bf16, matching MOEFeedForward.forward."""
    D = gate_w.shape[1]
    x2d = x.reshape(-1, D)
    probs = moe_gating(x2d, gate_w, tile_t=tile_t)
    # TODO(synk): top-k expert selection has no clean Pallas equivalent; done in plain JAX.
    ew, ei = jax.lax.top_k(probs, num_activated_experts)
    return moe_after_gating(x2d, w1, w2, w3, ew, ei, tile_t=tile_t, tile_i=tile_i)


# ------------------------------ pure-JAX reference -----------------------------
def moe_after_gating_reference(x2d, w1, w2, w3, expert_weights, expert_indices):
    xf = x2d.astype(jnp.float32)
    ew = expert_weights.astype(jnp.float32)
    ew = ew / jnp.sum(ew, axis=-1, keepdims=True)
    w1g = w1[expert_indices].astype(jnp.float32)   # (T, A, I, D)
    w3g = w3[expert_indices].astype(jnp.float32)
    w2g = w2[expert_indices].astype(jnp.float32)   # (T, A, D, I)
    x1 = jax.nn.silu(jnp.einsum('ti,taoi->tao', xf, w1g))
    x3 = jnp.einsum('ti,taoi->tao', xf, w3g)
    eo = jnp.einsum('tao,taio->tai', x1 * x3, w2g)
    return jnp.einsum('tai,ta->ti', eo, ew)


if __name__ == "__main__":
    # small ModelArgs-like config
    dim = 64
    intermediate_size = find_multiple(int(2 * (4 * dim) / 3), 256)   # = 256
    num_experts = 8
    num_activated_experts = 2

    key = jax.random.PRNGKey(0)
    k1, k2, k3, k4, k5, k6 = jax.random.split(key, 6)
    gate_w = (0.1 * jax.random.normal(k1, (num_experts, dim))).astype(jnp.bfloat16)
    w1 = (0.05 * jax.random.normal(k2, (num_experts, intermediate_size, dim))).astype(jnp.bfloat16)
    w2 = (0.05 * jax.random.normal(k3, (num_experts, dim, intermediate_size))).astype(jnp.bfloat16)
    w3 = (0.05 * jax.random.normal(k4, (num_experts, intermediate_size, dim))).astype(jnp.bfloat16)

    # input: (batch=2, seq=16, dim=64) -> T = 32 tokens after flattening
    x = (0.5 * jax.random.normal(k5, (2, 16, dim))).astype(jnp.bfloat16)
    x2d = x.reshape(-1, dim)
    T = x2d.shape[0]

    # 1) gating kernel vs f32 reference
    probs_k = jax.block_until_ready(moe_gating(x2d, gate_w))
    probs_r = jax.nn.softmax(x2d.astype(jnp.float32) @ gate_w.astype(jnp.float32).T, axis=-1)
    assert jnp.allclose(probs_k, probs_r, rtol=2e-2, atol=2e-2)

    # reference combine built from the same gating probabilities (robust to top-k tie order)
    ew, ei = jax.lax.top_k(probs_k, num_activated_experts)
    ref = moe_after_gating_reference(x2d, w1, w2, w3, ew, ei)

    # 2) full forward, forced multi-tile path (T tiles = 2, I tiles = 2)
    out1 = jax.block_until_ready(
        moe_feed_forward(x, gate_w, w1, w2, w3, num_activated_experts, tile_t=16, tile_i=128))
    assert out1.shape == (T, dim) and out1.dtype == jnp.bfloat16
    assert jnp.allclose(out1.astype(jnp.float32), ref, rtol=5e-2, atol=3e-2)

    # 3) full forward, auto-selected (VMEM-budgeted) tiles
    out2 = jax.block_until_ready(
        moe_feed_forward(x, gate_w, w1, w2, w3, num_activated_experts))
    assert jnp.allclose(out2.astype(jnp.float32), ref, rtol=5e-2, atol=3e-2)

    # 4) after-gating with only 3 of 8 experts active (exercises active-expert skipping)
    ei_s = jnp.stack([jnp.where(jnp.arange(T) % 2 == 0, 1, 2),
                      jnp.full((T,), 5)], axis=1).astype(jnp.int32)
    ew_s = jax.random.uniform(k6, (T, num_activated_experts), jnp.float32, 0.1, 1.0)
    out_s = jax.block_until_ready(moe_after_gating(x2d, w1, w2, w3, ew_s, ei_s))
    ref_s = moe_after_gating_reference(x2d, w1, w2, w3, ew_s, ei_s)
    assert jnp.allclose(out_s.astype(jnp.float32), ref_s, rtol=5e-2, atol=3e-2)

    print("KERNEL_OK")
</pallas_src>

<mosaic_0001>
module attributes {stable_mosaic.version = 11 : i64} {
  func.func @gating_kernel(%arg0: i32, %arg1: memref<32x64xbf16, #tpu.memory_space<vmem>>, %arg2: memref<64x128xbf16, #tpu.memory_space<vmem>>, %arg3: memref<32x128xf32, #tpu.memory_space<vmem>>) attributes {dimension_semantics = [#tpu.dimension_semantics<parallel>], iteration_bounds = array<i64: 1>, scalar_prefetch = 0 : i64, scratch_operands = 0 : i64, tpu.core_type = #tpu.core_type<tc>, window_params = [{transform_indices = @transform_0, window_bounds = array<i64: 32, 64>}, {pipeline_mode = #tpu.pipeline_mode<synchronous>, transform_indices = @transform_1, window_bounds = array<i64: 64, 128>}, {transform_indices = @transform_2, window_bounds = array<i64: 32, 128>}]} {
    %c0 = arith.constant 0 : index
    %c0_0 = arith.constant 0 : index
    %0 = vector.load %arg1[%c0, %c0_0] : memref<32x64xbf16, #tpu.memory_space<vmem>>, vector<32x64xbf16>
    %c0_1 = arith.constant 0 : index
    %c0_2 = arith.constant 0 : index
    %1 = vector.load %arg2[%c0_1, %c0_2] : memref<64x128xbf16, #tpu.memory_space<vmem>>, vector<64x128xbf16>
    %cst = arith.constant dense<0.000000e+00> : vector<32x128xf32>
    %2 = tpu.matmul %0, %1, %cst {dimension_numbers = #tpu.dot_dimension_numbers<[1], [0], [0], [1], [0, 0, 1, 1], [], []>} : vector<32x64xbf16>, vector<64x128xbf16>, vector<32x128xf32> -> vector<32x128xf32>
    %3 = tpu.iota {dimensions = array<i32: 1>} : vector<32x128xi32>
    %c8_i32 = arith.constant 8 : i32
    %4 = vector.broadcast %c8_i32 : i32 to vector<32x128xi32>
    %5 = arith.cmpi slt, %3, %4 : vector<32x128xi32>
    %cst_3 = arith.constant -1.000000e+30 : f32
    %6 = vector.broadcast %cst_3 : f32 to vector<32x128xf32>
    %7 = arith.select %5, %2, %6 : vector<32x128xi1>, vector<32x128xf32>
    %cst_4 = arith.constant dense<0xFF800000> : vector<32xf32>
    %8 = vector.multi_reduction <maximumf>, %7, %cst_4 [1] : vector<32x128xf32> to vector<32xf32>
    %9 = vector.shape_cast %8 : vector<32xf32> to vector<32x1xf32>
    %10 = vector.broadcast %9 : vector<32x1xf32> to vector<32x128xf32>
    %11 = arith.subf %7, %10 : vector<32x128xf32>
    %12 = math.exp %11 : vector<32x128xf32>
    %cst_5 = arith.constant dense<0.000000e+00> : vector<32xf32>
    %13 = vector.multi_reduction <add>, %12, %cst_5 [1] : vector<32x128xf32> to vector<32xf32>
    %14 = vector.shape_cast %13 : vector<32xf32> to vector<32x1xf32>
    %15 = tpu.reciprocal %14 {approx = true} : vector<32x1xf32> -> vector<32x1xf32>
    %16 = vector.broadcast %15 : vector<32x1xf32> to vector<32x128xf32>
    %17 = arith.mulf %12, %16 : vector<32x128xf32>
    %c0_6 = arith.constant 0 : index
    %c0_7 = arith.constant 0 : index
    %18 = vector.load %arg3[%c0_6, %c0_7] : memref<32x128xf32, #tpu.memory_space<vmem>>, vector<32x128xf32>
    tpu.vector_store %arg3[%c0_6, %c0_7], %17 {strides = array<i32>} : memref<32x128xf32, #tpu.memory_space<vmem>>, vector<32x128xf32>,
    return
  }
  func.func @transform_0(%arg0: i32) -> (i32, i32) {
    %c0_i32 = arith.constant 0 : i32
    %c0_i32_0 = arith.constant 0 : i32
    return %arg0, %c0_i32 : i32, i32
  }
  func.func @transform_1(%arg0: i32) -> (i32, i32) {
    %c0_i32 = arith.constant 0 : i32
    %c0_i32_0 = arith.constant 0 : i32
    %c0_i32_1 = arith.constant 0 : i32
    return %c0_i32, %c0_i32_0 : i32, i32
  }
  func.func @transform_2(%arg0: i32) -> (i32, i32) {
    %c0_i32 = arith.constant 0 : i32
    %c0_i32_0 = arith.constant 0 : i32
    return %arg0, %c0_i32 : i32, i32
  }
}

</mosaic_0001>

<bundles_post_ra>
// kernel: tpu_custom_call.1
= control target key start
LH: loop header
LB: loop body
LE: loop exit
PB: predicated region body
PF: predicated region fallthrough
CT: control target
= control target key end

     0   :  { %7 = vsyncpa [#allocation3], 0  ;;  %s360_s0 = inlined_call_operand.hbm [shape: bf16[32,64], index: 0, kind: input, shape index: {}]   ;;  %s361_s1 = inlined_call_operand.hbm [shape: bf16[64,128], index: 1, kind: input, shape index: {}]   ;;  %s362_s2 = inlined_call_operand.hbm [shape: f32[32,128], index: 2, kind: output, shape index: {}]  }
   0x1   :  { %8 = vsyncpa [#allocation6], 0 }
   0x2   :  { %9 = vsyncpa [#allocation4], 0  ;;  %s329_s9 = smov [#allocation2]  }
   0x3   :  { %s15_s10 = sshll.u32 %s329_s9, 4  ;;  %s16_s10 = int_to_ptr.vmem [resolvable:$true] %s15_s10 }
   0x4   :  { %s271_s11 = scalar_lea.vmem %s16_s10, 256  ;;  %p276_p1 = scmp.lt.s32.totalorder %s16_s10, %s16_s10 }
   0x5   :  { %p272_p0 = scmp.ne.s32.totalorder %s16_s10, %s271_s11  ;;  %p277_p2 = scmp.lt.s32.totalorder %s271_s11, %s271_s11 }
   0x7   :  { %p278_p3 = por %p277_p2, %p276_p1 }
   0x9   :  { %p279_p4 = pnand %p278_p3, %p272_p0 }
   0xb   :  { %282 = shalt.err (!%p279_p4)
}
   0xc   :  { %s330_s12 = smov 64   ;;  %s331_s13 = smov 4  }
   0xd   :  { %21 = dma.hbm_to_vmem [thread:$0]  %s360_s0, 256, %s16_s10, [#allocation3], %s330_s12, %s330_s12, %s331_s13  }
   0xe   :  { %s332_s16 = smov [#allocation5]  }
   0xf   :  { %s27_s17 = sshll.u32 %s332_s16, 4  ;;  %s28_s17 = int_to_ptr.vmem [resolvable:$true] %s27_s17 }
  0x10   :  { %s291_s18 = scalar_lea.vmem %s28_s17, 512  ;;  %p296_p6 = scmp.lt.s32.totalorder %s28_s17, %s28_s17 }
  0x11   :  { %p292_p5 = scmp.ne.s32.totalorder %s28_s17, %s291_s18  ;;  %p297_p7 = scmp.lt.s32.totalorder %s291_s18, %s291_s18 }
  0x13   :  { %p298_p8 = por %p297_p7, %p296_p6 }
  0x15   :  { %p299_p9 = pnand %p298_p8, %p292_p5 }
  0x17   :  { %302 = shalt.err (!%p299_p9)
}
  0x18   :  { %33 = dma.hbm_to_vmem [thread:$0]  %s361_s1, 512, %s28_s17, [#allocation6], %s330_s12, %s330_s12, %s331_s13  }
  0x19   :  { %323 = dma.done.wait [#allocation3], 256  }
  0x1a   :  { %324 = vsyncadd [#allocation3], 4294967040 }
  0x1b   :  { %325 = dma.done.wait [#allocation6], 512  }
  0x1c   :  { %326 = vsyncadd [#allocation6], 4294966784  ;;  %v241_v0 = vld [vmem:[#allocation5 + $0x18] sm:$0xff]   ;;  %v242_v1 = vld [vmem:[#allocation5 + $0x10] sm:$0xff]   ;;  %vm87_vm0 = vcmask 523264   ;;  %v143_v6 = vlaneseq  ;;  %s333_s0 = smov [#allocation7]  }
  0x1d   :  { %222 = vmatprep.subr.bf16.mxu0 %v241_v0  ;;  %v243_v2 = vld [vmem:[#allocation5 + $0x8] sm:$0xff]   ;;  %v245_v3 = vld [vmem:[#allocation2] sm:$0xff]   ;;  %v244_v4 = vld [vmem:[#allocation5] sm:$0xff]   ;;  %s195_s1 = sshll.u32 %s333_s0, 4  ;;  %s196_s1 = int_to_ptr.vmem [resolvable:$true] %s195_s1 }
  0x1e   :  { %223 = vmatpush3.bf16.msra.mxu0 %v241_v0  ;;  %230 = vmatprep.mubr.msk.bf16.mxu0 %vm87_vm0, %v245_v3  ;;  %v246_v5 = vld [vmem:[#allocation2 + $0x8] sm:$0xff]   ;;  %v144_v7 = vand.u32 127, %v143_v6  ;;  %s303_s21 = scalar_lea.vmem %s196_s1, 512  ;;  %p308_p11 = scmp.lt.s32.totalorder %s196_s1, %s196_s1 }
  0x1f   :  { %224 = vmatprep.subr.bf16.mxu0 %v242_v1  ;;  %p304_p10 = scmp.ne.s32.totalorder %s196_s1, %s303_s21  ;;  %p309_p12 = scmp.lt.s32.totalorder %s303_s21, %s303_s21 }
  0x20   :  { %vm145_vm1 = vcmp.lt.s32.totalorder %v144_v7, 8 }
  0x21   :  { %p310_p13 = por %p309_p12, %p308_p11 }
  0x22   :  { %225 = vmatpush3.bf16.msra.mxu0 %v242_v1 }
  0x23   :  { %226 = vmatprep.subr.bf16.mxu0 %v243_v2  ;;  %p311_p0 = pnand %p310_p13, %p304_p10 }
  0x26   :  { %227 = vmatpush3.bf16.msra.mxu0 %v243_v2 }
  0x27   :  { %228 = vmatprep.subr.bf16.mxu0 %v244_v4 }
  0x2a   :  { %229 = vmatpush3.bf16.msra.mxu0 %v244_v4 }
  0x2d   :  { %231 = vmatmul.mubr.msk.bf16.vlgmr.msra.gmra.mxu0 %vm87_vm0, %v246_v5 }
  0xed   :  { %v232_v8 = vpop.f32.mrf.mxu0 }
  0xee   :  { %v148_v9 = vsel %vm145_vm1, %v232_v8, -1e+30 }
  0xef   :  { %154 = vmax.xlane.f32.xlu1 %v148_v9  ;;  %v128_v10 = vpop.f32.mrf.mxu0 }
  0xf0   :  { %v146_v11 = vsel %vm145_vm1, %v128_v10, -1e+30 }
  0xf1   :  { %150 = vmax.xlane.f32.xlu0 %v146_v11  ;;  %v233_v12 = vpop.f32.mrf.mxu0 }
  0xf2   :  { %v149_v13 = vsel %vm145_vm1, %v233_v12, -1e+30 }
  0xf3   :  { %156 = vmax.xlane.f32.xlu1 %v149_v13  ;;  %v131_v14 = vpop.f32.mrf.mxu0 }
  0xf4   :  { %v147_v15 = vsel %vm145_vm1, %v131_v14, -1e+30 }
  0xf5   :  { %152 = vmax.xlane.f32.xlu0 %v147_v15 }
 0x178   :  { %v155_v16 = vpop.xlane.xlu1 %154 }
 0x179   :  { %v160_v17 = vsub.f32 %v148_v9, %v155_v16 }
 0x17a   :  { %v151_v18 = vpop.xlane.xlu0 %150 }
 0x17b   :  { %v158_v19 = vsub.f32 %v146_v11, %v151_v18  ;;  %v166_v22 = vmul.f32 1.442695, %v160_v17 }
 0x17c   :  { %v157_v20 = vpop.xlane.xlu1 %156 }
 0x17d   :  { %v162_v21 = vmul.f32 1.442695, %v158_v19  ;;  %v161_v24 = vsub.f32 %v149_v13, %v157_v20 }
 0x17e   :  { %v153_v23 = vpop.xlane.xlu0 %152 }
 0x17f   :  { %247 = vpow2.f32 %v162_v21  ;;  %v159_v25 = vsub.f32 %v147_v15, %v153_v23  ;;  %v168_v27 = vmul.f32 1.442695, %v161_v24 }
 0x180   :  { %249 = vpow2.f32 %v166_v22 }
 0x181   :  { %v164_v26 = vmul.f32 1.442695, %v159_v25 }
 0x183   :  { %251 = vpow2.f32 %v164_v26 }
 0x184   :  { %253 = vpow2.f32 %v168_v27 }
 0x18c   :  { %v248_v28 = vpop.eup %247 }
 0x18d   :  { %170 = vadd.xlane.f32.xlu0 %v248_v28  ;;  %v250_v29 = vpop.eup %249 }
 0x190   :  { %v252_v30 = vpop.eup %251 }
 0x191   :  { %174 = vadd.xlane.f32.xlu0 %v250_v29  ;;  %172 = vadd.xlane.f32.xlu1 %v252_v30  ;;  %v254_v31 = vpop.eup %253 }
 0x195   :  { %176 = vadd.xlane.f32.xlu1 %v254_v31 }
 0x216   :  { %v171_v32 = vpop.xlane.xlu0 %170 }
 0x217   :  { %255 = vrcp.f32 %v171_v32 }
 0x21a   :  { %v173_v33 = vpop.xlane.xlu1 %172  ;;  %v175_v34 = vpop.xlane.xlu0 %174 }
 0x21b   :  { %257 = vrcp.f32 %v173_v33 }
 0x21c   :  { %259 = vrcp.f32 %v175_v34 }
 0x21e   :  { %v177_v35 = vpop.xlane.xlu1 %176 }
 0x21f   :  { %261 = vrcp.f32 %v177_v35 }
 0x224   :  { %v256_v36 = vpop.eup %255 }
 0x225   :  { %v182_v37 = vmul.f32 %v256_v36, %v248_v28 }
 0x227   :  { %186 = vst [vmem:[#allocation7] sm:$0xff] %v182_v37 }
 0x228   :  { %v258_v38 = vpop.eup %257 }
 0x229   :  { %v260_v39 = vpop.eup %259  ;;  %v183_v40 = vmul.f32 %v258_v38, %v252_v30 }
 0x22a   :  { %v184_v41 = vmul.f32 %v260_v39, %v250_v29 }
 0x22b   :  { %187 = vst [vmem:[#allocation7 + $0x8] sm:$0xff] %v183_v40 }
 0x22c   :  { %v262_v42 = vpop.eup %261  ;;  %188 = vst [vmem:[#allocation7 + $0x10] sm:$0xff] %v184_v41 }
 0x22d   :  { %v185_v43 = vmul.f32 %v262_v42, %v254_v31 }
 0x22f   :  { %189 = vst [vmem:[#allocation7 + $0x18] sm:$0xff] %v185_v43 }
 0x230   :  { %314 = shalt.err (!%p311_p0)
}
 0x231   :  { %s334_s22 = smov 128   ;;  %s335_s23 = smov 8  }
 0x232   :  { %201 = dma.vmem_to_hbm [thread:$0]  %s196_s1, 512, %s362_s2, [#allocation4], %s334_s22, %s334_s22, %s335_s23  }
 0x233   :  { %327 = dma.done.wait [#allocation4], 512  }
 0x234   :  { %328 = vsyncadd [#allocation4], 4294966784 }
 0x235   :  { %205 = vsyncpa [#allocation3], 1 }
 0x236   :  { %206 = vsyncpa [#allocation6], 1 }
 0x237   :  { %207 = vsyncpa [#allocation4], 1 }

</bundles_post_ra>
